<compile_context>
chip_gen: v7x
topology: tpu7x:2x2x1
jax: 0.10.0
libtpu: 0.0.40
codegen_flags: <defaults>
</compile_context>

<pallas_src>
import functools

import jax
import jax.numpy as jnp
import numpy as np
from jax.experimental import pallas as pl
from jax.experimental.pallas import tpu as pltpu


def _vmem_cap_bytes(default_phys=64 << 20):
    """~3/4 of physical VMEM (≈96 MiB on v5e/v6e, ≈48 MiB on v7x)."""
    try:
        phys = pltpu.get_tpu_info().vmem_capacity_bytes
    except Exception:
        phys = default_phys
    return int(phys) * 3 // 4


def _pick_tile(total, per_row_bytes, budget_bytes, aligns=(8,)):
    """Largest multiple of one of `aligns` (tried in order; MXU/sublane friendly)
    that divides `total` and roughly fits the byte budget; falls back to `total`."""
    total = int(total)
    max_rows = int(budget_bytes) // max(int(per_row_bytes), 1)
    if total <= max(max_rows, int(aligns[-1])):
        return total
    for align in aligns:
        align = int(align)
        cap_rows = max(max_rows, align)          # never go below one MXU tile
        t = min((cap_rows // align) * align, (total // align) * align)
        while t >= align:
            if total % t == 0:
                return t
            t -= align
    return total


# ---------------------------------------------------------------------------
# Kernel 1: fused embedding gather + masked mean pooling (+ optional L2 norm)
#   grid = (2, B // TB); group axis 0 selects the query/key stream; per-stream
#   normalize flags are scalar-prefetched into SMEM.
# ---------------------------------------------------------------------------
def _encode_pool_kernel(norm_flags_ref, tok_ref, mask_ref, table_ref, out_ref, *,
                        vocab):
    g = pl.program_id(0)

    tok = tok_ref[0]                                     # (TB, S) int32
    mask = mask_ref[0].astype(jnp.float32)               # (TB, S)
    tb, s = tok.shape

    # masked-mean weights; exact reciprocal (approx buys nothing, costs accuracy).
    cnt = jnp.sum(mask, axis=1, keepdims=True)           # (TB, 1)
    w = mask * (1.0 / jnp.maximum(cnt, 1e-6))            # (TB, S)

    # Fused gather: pooled[b,:] = sum_s w[b,s] * table[tok[b,s], :]
    #             = (sum_s w[b,s] * onehot(tok[b,s])) @ table   -> one MXU matmul.
    vid = jax.lax.broadcasted_iota(jnp.int32, (tb, s, vocab), 2)
    onehot = (tok[:, :, None] == vid).astype(jnp.float32)            # (TB, S, V)
    a = jnp.sum(onehot * w[:, :, None], axis=1)                      # (TB, V)
    pooled = jax.lax.dot_general(
        a, table_ref[...],
        dimension_numbers=(((1,), (0,)), ((), ())),
        preferred_element_type=jnp.float32)                          # (TB, H) f32

    # Optional L2 normalize, selected per stream via the prefetched flag.
    fsel = (norm_flags_ref[g] > 0).astype(jnp.float32)
    sq = jnp.sum(pooled * pooled, axis=-1, keepdims=True)
    normed = pooled * jax.lax.rsqrt(jnp.maximum(sq, 1e-12))
    out_ref[0] = (fsel * normed + (1.0 - fsel) * pooled).astype(out_ref.dtype)


def encode_pool(norm_flags, tokens, masks, emb_table, *, batch_tile=None,
                tile_budget_bytes=8 << 20):
    """tokens: (2, B, S) int32; masks: (2, B, S) any dtype; emb_table: (V, H)."""
    G, B, S = tokens.shape
    V, H = emb_table.shape

    per_row = (S * (tokens.dtype.itemsize + masks.dtype.itemsize)
               + S * V * 4 + V * 4 + 2 * H * 4)
    TB = batch_tile or _pick_tile(B, per_row, tile_budget_bytes, aligns=(8,))

    need = (2 * TB * S * (tokens.dtype.itemsize + masks.dtype.itemsize)
            + 2 * TB * H * 4
            + 2 * V * H * emb_table.dtype.itemsize      # resident table (double-buffered)
            + TB * S * V * 4 + TB * V * 4)
    vmem_limit = int(min(max(2 * need, 16 << 20), _vmem_cap_bytes()))

    kernel = functools.partial(_encode_pool_kernel, vocab=V)
    return pl.pallas_call(
        kernel,
        out_shape=jax.ShapeDtypeStruct((G, B, H), jnp.float32),
        grid_spec=pltpu.PrefetchScalarGridSpec(
            num_scalar_prefetch=1,
            grid=(G, B // TB),
            in_specs=[
                pl.BlockSpec((1, TB, S), lambda g, i, flags: (g, i, 0)),
                pl.BlockSpec((1, TB, S), lambda g, i, flags: (g, i, 0)),
                pl.BlockSpec((V, H), lambda g, i, flags: (0, 0)),   # resident table
            ],
            out_specs=pl.BlockSpec((1, TB, H), lambda g, i, flags: (g, i, 0)),
        ),
        compiler_params=pltpu.CompilerParams(
            dimension_semantics=("parallel", "parallel"),
            vmem_limit_bytes=vmem_limit,
        ),
        cost_estimate=pl.CostEstimate(
            flops=int(G * B * (3 * S * V + 2 * V * H + 4 * H)),
            transcendentals=int(G * B),
            bytes_accessed=int(tokens.size * tokens.dtype.itemsize
                               + masks.size * masks.dtype.itemsize
                               + G * V * H * emb_table.dtype.itemsize
                               + G * B * H * 4),
        ),
    )(norm_flags, tokens, masks, emb_table)


# ---------------------------------------------------------------------------
# Kernel 2: in-batch contrastive head (query-tiled, keys resident, bf16 MXU)
#   Each query tile is independent (keys fully resident) and writes its own
#   per-row smoothed-NLL and correctness tiles -> fully "parallel" grid axis.
# ---------------------------------------------------------------------------
def _inbatch_head_kernel(q_ref, kt_ref, loss_ref, corr_ref, *,
                         inv_temperature, label_smoothing, batch_size, tile_q):
    i = pl.program_id(0)
    B = batch_size

    # Fold 1/temperature into the (TQ, H) query tile (cheaper than scaling the
    # (TQ, B) score tile when B > H), then feed the MXU bf16 with f32 accum.
    q = q_ref[...].astype(jnp.float32) * inv_temperature
    scores = jax.lax.dot_general(
        q.astype(jnp.bfloat16), kt_ref[...],
        dimension_numbers=(((1,), (0,)), ((), ())),
        preferred_element_type=jnp.float32)                          # (TQ, B)

    row = jax.lax.broadcasted_iota(jnp.int32, (tile_q, B), 0) + i * tile_q
    col = jax.lax.broadcasted_iota(jnp.int32, (tile_q, B), 1)

    # Label-smoothed NLL, algebraic form (no onehot / target / logp tiles):
    #   nll_r = logsumexp_r - (1-eps)*s[r, r] - (eps/B) * sum_j s[r, j]
    m = jnp.max(scores, axis=-1, keepdims=True)
    lse = m + jnp.log(jnp.sum(jnp.exp(scores - m), axis=-1, keepdims=True))
    diag = jnp.sum(jnp.where(col == row, scores, 0.0), axis=-1, keepdims=True)
    ssum = jnp.sum(scores, axis=-1, keepdims=True)
    eps = label_smoothing
    loss_ref[...] = lse - (1.0 - eps) * diag - (eps / B) * ssum      # (TQ, 1)

    # Accuracy: first-occurrence argmax == diagonal label.
    pred = jnp.min(jnp.where(scores >= m, col, B), axis=-1, keepdims=True)
    corr_ref[...] = (pred == row[:, 0:1]).astype(jnp.float32)        # (TQ, 1)


def inbatch_loss(qemb, kemb, *, temperature, label_smoothing, query_tile=None,
                 tile_budget_bytes=16 << 20):
    B, H = qemb.shape

    # Keys: pre-transposed ONCE to a (H, B) bf16 block -> natural MXU RHS, no
    # per-tile transpose in the kernel, half the resident VMEM.
    kt = jnp.transpose(kemb.astype(jnp.bfloat16))

    # MXU-aligned query tile (prefer multiples of 256 / 128).
    per_row = H * 4 + 4 * B * 4
    TQ = query_tile or _pick_tile(B, per_row, tile_budget_bytes,
                                  aligns=(256, 128, 8))

    need = 2 * TQ * H * 4 + 2 * H * B * 2 + 6 * TQ * B * 4 + 4 * TQ * 4
    vmem_limit = int(min(max(2 * need, 16 << 20), _vmem_cap_bytes()))

    kernel = functools.partial(
        _inbatch_head_kernel,
        inv_temperature=float(1.0 / temperature),
        label_smoothing=float(label_smoothing),
        batch_size=B, tile_q=TQ)

    per_row_loss, per_row_corr = pl.pallas_call(
        kernel,
        out_shape=(jax.ShapeDtypeStruct((B, 1), jnp.float32),
                   jax.ShapeDtypeStruct((B, 1), jnp.float32)),
        grid_spec=pltpu.PrefetchScalarGridSpec(
            num_scalar_prefetch=0,
            grid=(B // TQ,),
            in_specs=[
                pl.BlockSpec((TQ, H), lambda i: (i, 0)),    # query tiles stream
                pl.BlockSpec((H, B), lambda i: (0, 0)),     # keys resident (bf16)
            ],
            out_specs=[pl.BlockSpec((TQ, 1), lambda i: (i, 0)),
                       pl.BlockSpec((TQ, 1), lambda i: (i, 0))],
        ),
        compiler_params=pltpu.CompilerParams(
            dimension_semantics=("parallel",),   # tiles independent -> v7x megacore
            vmem_limit_bytes=vmem_limit,
        ),
        cost_estimate=pl.CostEstimate(
            flops=int(2 * B * B * H + 10 * B * B),
            transcendentals=int(B * B),
            bytes_accessed=int(B * H * 4 + H * B * 2 + 2 * B * 4),
        ),
    )(qemb, kt)

    loss = jnp.mean(per_row_loss)
    accuracy = 100.0 * jnp.mean(per_row_corr)
    return loss, accuracy


# ---------------------------------------------------------------------------
# Full "InBatch.forward" equivalent
# ---------------------------------------------------------------------------
def inbatch_forward(emb_table, q_tokens, q_mask, k_tokens, k_mask, *,
                    temperature, label_smoothing, norm_query, norm_doc,
                    stats_prefix=""):
    tokens = jnp.stack([q_tokens, k_tokens]).astype(jnp.int32)   # (2, B, S)
    masks = jnp.stack([q_mask, k_mask])                          # (2, B, S); cast in-kernel
    norm_flags = jnp.array([norm_query, norm_doc], dtype=jnp.int32)

    pooled = encode_pool(norm_flags, tokens, masks, emb_table)   # (2, B, H) f32
    qemb, kemb = pooled[0], pooled[1]

    loss, accuracy = inbatch_loss(qemb, kemb, temperature=temperature,
                                  label_smoothing=label_smoothing)

    # stdq/stdk are O(B*H) on data already returned -> plain JAX (perf review).
    stdq = jnp.mean(jnp.std(qemb, axis=0, ddof=1))
    stdk = jnp.mean(jnp.std(kemb, axis=0, ddof=1))

    if stats_prefix:
        stats_prefix = stats_prefix + "/"
    iter_stats = {
        f"{stats_prefix}loss": loss,
        f"{stats_prefix}accuracy": accuracy,
        f"{stats_prefix}stdq": stdq,
        f"{stats_prefix}stdk": stdk,
    }
    return loss, iter_stats, qemb, kemb


# ---------------------------------------------------------------------------
# Pure-JAX references for validation
# ---------------------------------------------------------------------------
def ref_encode(emb_table, tokens, mask, normalize):
    h = jnp.take(emb_table, tokens, axis=0)
    m = mask.astype(jnp.float32)
    pooled = jnp.sum(h * m[:, :, None], axis=1) / jnp.sum(m, axis=1, keepdims=True)
    if normalize:
        pooled = pooled / jnp.linalg.norm(pooled, axis=-1, keepdims=True)
    return pooled


def ref_head(qemb, kemb, *, temperature, label_smoothing):
    # precision-matched to the kernel: bf16 MXU inputs, f32 accumulation.
    B = qemb.shape[0]
    scores = jnp.dot((qemb * (1.0 / temperature)).astype(jnp.bfloat16),
                     kemb.astype(jnp.bfloat16).T,
                     preferred_element_type=jnp.float32)
    logp = jax.nn.log_softmax(scores, axis=-1)
    target = (1.0 - label_smoothing) * jnp.eye(B) + label_smoothing / B
    loss = -jnp.sum(target * logp) / B
    acc = 100.0 * jnp.mean(
        (jnp.argmax(scores, axis=-1) == jnp.arange(B)).astype(jnp.float32))
    return loss, acc


if __name__ == "__main__":
    VOCAB, B, S, H = 64, 8, 16, 128   # H lane-aligned (multiple of 128)
    temperature = 0.05
    label_smoothing = 0.1
    norm_query = True
    norm_doc = True

    key = jax.random.PRNGKey(0)
    k_emb, k_q, k_k, k_ql, k_kl = jax.random.split(key, 5)

    emb_table = 0.1 * jax.random.normal(k_emb, (VOCAB, H), dtype=jnp.float32)
    q_tokens = jax.random.randint(k_q, (B, S), 0, VOCAB, dtype=jnp.int32)
    k_tokens = jax.random.randint(k_k, (B, S), 0, VOCAB, dtype=jnp.int32)

    q_len = jax.random.randint(k_ql, (B,), S // 2, S + 1, dtype=jnp.int32)
    k_len = jax.random.randint(k_kl, (B,), S // 2, S + 1, dtype=jnp.int32)
    pos = jnp.arange(S, dtype=jnp.int32)[None, :]
    q_mask = (pos < q_len[:, None]).astype(jnp.float32)
    k_mask = (pos < k_len[:, None]).astype(jnp.float32)

    loss, iter_stats, qemb, kemb = inbatch_forward(
        emb_table, q_tokens, q_mask, k_tokens, k_mask,
        temperature=temperature, label_smoothing=label_smoothing,
        norm_query=norm_query, norm_doc=norm_doc)
    jax.block_until_ready((loss, iter_stats, qemb, kemb))

    # (1) fused gather + pooling + normalize vs pure-JAX encoder reference.
    r_qemb = ref_encode(emb_table, q_tokens, q_mask, norm_query)
    r_kemb = ref_encode(emb_table, k_tokens, k_mask, norm_doc)
    np.testing.assert_allclose(np.asarray(qemb), np.asarray(r_qemb), rtol=2e-3, atol=3e-3)
    np.testing.assert_allclose(np.asarray(kemb), np.asarray(r_kemb), rtol=2e-3, atol=3e-3)

    # (2) contrastive head vs reference computed from the same embeddings.
    r_loss, r_acc = ref_head(qemb, kemb, temperature=temperature,
                             label_smoothing=label_smoothing)
    np.testing.assert_allclose(np.asarray(loss), np.asarray(r_loss), rtol=1e-3, atol=1e-3)
    np.testing.assert_allclose(np.asarray(iter_stats["accuracy"]), np.asarray(r_acc),
                               rtol=1e-3, atol=1e-3)

    # (3) stdq / stdk (unbiased std over the batch, as in torch.std).
    r_stdq = jnp.mean(jnp.std(r_qemb, axis=0, ddof=1))
    r_stdk = jnp.mean(jnp.std(r_kemb, axis=0, ddof=1))
    np.testing.assert_allclose(np.asarray(iter_stats["stdq"]), np.asarray(r_stdq),
                               rtol=2e-3, atol=2e-3)
    np.testing.assert_allclose(np.asarray(iter_stats["stdk"]), np.asarray(r_stdk),
                               rtol=2e-3, atol=2e-3)

    print("KERNEL_OK")
</pallas_src>

<mosaic_0001>
module attributes {stable_mosaic.version = 11 : i64} {
  func.func @_encode_pool_kernel(%arg0: i32, %arg1: i32, %arg2: memref<2xi32, #tpu.memory_space<smem>>, %arg3: memref<1x8x16xi32, #tpu.memory_space<vmem>>, %arg4: memref<1x8x16xf32, #tpu.memory_space<vmem>>, %arg5: memref<64x128xf32, #tpu.memory_space<vmem>>, %arg6: memref<1x8x128xf32, #tpu.memory_space<vmem>>) attributes {dimension_semantics = [#tpu.dimension_semantics<parallel>, #tpu.dimension_semantics<parallel>], iteration_bounds = array<i64: 2, 1>, scalar_prefetch = 1 : i64, scratch_operands = 0 : i64, tpu.core_type = #tpu.core_type<tc>, window_params = [{transform_indices = @transform_0, window_bounds = array<i64: 1, 8, 16>}, {transform_indices = @transform_1, window_bounds = array<i64: 1, 8, 16>}, {pipeline_mode = #tpu.pipeline_mode<synchronous>, transform_indices = @transform_2, window_bounds = array<i64: 64, 128>}, {transform_indices = @transform_3, window_bounds = array<i64: 1, 8, 128>}]} {
    %c0 = arith.constant 0 : index
    %c0_0 = arith.constant 0 : index
    %c0_1 = arith.constant 0 : index
    %0 = vector.load %arg3[%c0, %c0_0, %c0_1] : memref<1x8x16xi32, #tpu.memory_space<vmem>>, vector<1x8x16xi32>
    %1 = vector.shape_cast %0 : vector<1x8x16xi32> to vector<8x16xi32>
    %c0_2 = arith.constant 0 : index
    %c0_3 = arith.constant 0 : index
    %c0_4 = arith.constant 0 : index
    %2 = vector.load %arg4[%c0_2, %c0_3, %c0_4] : memref<1x8x16xf32, #tpu.memory_space<vmem>>, vector<1x8x16xf32>
    %3 = vector.shape_cast %2 : vector<1x8x16xf32> to vector<8x16xf32>
    %cst = arith.constant dense<0.000000e+00> : vector<8xf32>
    %4 = vector.multi_reduction <add>, %3, %cst [1] : vector<8x16xf32> to vector<8xf32>
    %5 = vector.shape_cast %4 : vector<8xf32> to vector<8x1xf32>
    %cst_5 = arith.constant 9.99999997E-7 : f32
    %6 = vector.broadcast %cst_5 : f32 to vector<8x1xf32>
    %7 = arith.maximumf %5, %6 : vector<8x1xf32>
    %cst_6 = arith.constant 1.000000e+00 : f32
    %8 = vector.broadcast %cst_6 : f32 to vector<8x1xf32>
    %9 = arith.divf %8, %7 : vector<8x1xf32>
    %10 = vector.broadcast %9 : vector<8x1xf32> to vector<8x16xf32>
    %11 = arith.mulf %3, %10 : vector<8x16xf32>
    %12 = tpu.iota {dimensions = array<i32: 2>} : vector<8x16x64xi32>
    %13 = vector.shape_cast %1 : vector<8x16xi32> to vector<8x16x1xi32>
    %14 = vector.broadcast %13 : vector<8x16x1xi32> to vector<8x16x64xi32>
    %15 = arith.cmpi eq, %14, %12 : vector<8x16x64xi32>
    %16 = arith.extui %15 : vector<8x16x64xi1> to vector<8x16x64xi32>
    %17 = arith.sitofp %16 : vector<8x16x64xi32> to vector<8x16x64xf32>
    %18 = vector.shape_cast %11 : vector<8x16xf32> to vector<8x16x1xf32>
    %19 = vector.broadcast %18 : vector<8x16x1xf32> to vector<8x16x64xf32>
    %20 = arith.mulf %17, %19 : vector<8x16x64xf32>
    %cst_7 = arith.constant dense<0.000000e+00> : vector<8x64xf32>
    %21 = vector.multi_reduction <add>, %20, %cst_7 [1] : vector<8x16x64xf32> to vector<8x64xf32>
    %c0_8 = arith.constant 0 : index
    %c0_9 = arith.constant 0 : index
    %22 = vector.load %arg5[%c0_8, %c0_9] : memref<64x128xf32, #tpu.memory_space<vmem>>, vector<64x128xf32>
    %cst_10 = arith.constant dense<0.000000e+00> : vector<8x128xf32>
    %23 = tpu.matmul %21, %22, %cst_10 {dimension_numbers = #tpu.dot_dimension_numbers<[1], [0], [0], [1], [0, 0, 1, 1], [], []>} : vector<8x64xf32>, vector<64x128xf32>, vector<8x128xf32> -> vector<8x128xf32>
    %24 = arith.index_cast %arg0 : i32 to index
    %25 = memref.load %arg2[%24] : memref<2xi32, #tpu.memory_space<smem>>
    %c0_i32 = arith.constant 0 : i32
    %26 = arith.cmpi sgt, %25, %c0_i32 : i32
    %27 = arith.extui %26 : i1 to i32
    %28 = arith.sitofp %27 : i32 to f32
    %29 = arith.mulf %23, %23 : vector<8x128xf32>
    %cst_11 = arith.constant dense<0.000000e+00> : vector<8xf32>
    %30 = vector.multi_reduction <add>, %29, %cst_11 [1] : vector<8x128xf32> to vector<8xf32>
    %31 = vector.shape_cast %30 : vector<8xf32> to vector<8x1xf32>
    %cst_12 = arith.constant 9.99999996E-13 : f32
    %32 = vector.broadcast %cst_12 : f32 to vector<8x1xf32>
    %33 = arith.maximumf %31, %32 : vector<8x1xf32>
    %34 = math.rsqrt %33 : vector<8x1xf32>
    %35 = vector.broadcast %34 : vector<8x1xf32> to vector<8x128xf32>
    %36 = arith.mulf %23, %35 : vector<8x128xf32>
    %37 = vector.broadcast %28 : f32 to vector<8x128xf32>
    %38 = arith.mulf %37, %36 : vector<8x128xf32>
    %cst_13 = arith.constant 1.000000e+00 : f32
    %39 = arith.subf %cst_13, %28 : f32
    %40 = vector.broadcast %39 : f32 to vector<8x128xf32>
    %41 = arith.mulf %40, %23 : vector<8x128xf32>
    %42 = arith.addf %38, %41 : vector<8x128xf32>
    %c0_14 = arith.constant 0 : index
    %c0_15 = arith.constant 0 : index
    %c0_16 = arith.constant 0 : index
    %43 = vector.load %arg6[%c0_14, %c0_15, %c0_16] : memref<1x8x128xf32, #tpu.memory_space<vmem>>, vector<1x8x128xf32>
    %44 = vector.shape_cast %43 : vector<1x8x128xf32> to vector<8x128xf32>
    %45 = vector.shape_cast %42 : vector<8x128xf32> to vector<1x8x128xf32>
    tpu.vector_store %arg6[%c0_14, %c0_15, %c0_16], %45 {strides = array<i32>} : memref<1x8x128xf32, #tpu.memory_space<vmem>>, vector<1x8x128xf32>,
    return
  }
  func.func @transform_0(%arg0: i32, %arg1: i32, %arg2: memref<2xi32, #tpu.memory_space<smem>>) -> (i32, i32, i32) {
    %c0_i32 = arith.constant 0 : i32
    %c0_i32_0 = arith.constant 0 : i32
    return %arg0, %arg1, %c0_i32 : i32, i32, i32
  }
  func.func @transform_1(%arg0: i32, %arg1: i32, %arg2: memref<2xi32, #tpu.memory_space<smem>>) -> (i32, i32, i32) {
    %c0_i32 = arith.constant 0 : i32
    %c0_i32_0 = arith.constant 0 : i32
    return %arg0, %arg1, %c0_i32 : i32, i32, i32
  }
  func.func @transform_2(%arg0: i32, %arg1: i32, %arg2: memref<2xi32, #tpu.memory_space<smem>>) -> (i32, i32) {
    %c0_i32 = arith.constant 0 : i32
    %c0_i32_0 = arith.constant 0 : i32
    %c0_i32_1 = arith.constant 0 : i32
    return %c0_i32, %c0_i32_0 : i32, i32
  }
  func.func @transform_3(%arg0: i32, %arg1: i32, %arg2: memref<2xi32, #tpu.memory_space<smem>>) -> (i32, i32, i32) {
    %c0_i32 = arith.constant 0 : i32
    %c0_i32_0 = arith.constant 0 : i32
    return %arg0, %arg1, %c0_i32 : i32, i32, i32
  }
}

</mosaic_0001>

<bundles_post_ra>
// kernel: tpu_custom_call.1
= control target key start
LH: loop header
LB: loop body
LE: loop exit
PB: predicated region body
PF: predicated region fallthrough
CT: control target
= control target key end

     0   :  { %s1600_s0 = inlined_call_operand.hbm [shape: s32[2], index: 0, kind: input, shape index: {}]   ;;  %s1601_s1 = inlined_call_operand.hbm [shape: s32[2,8,16], index: 1, kind: input, shape index: {}]   ;;  %s1602_s2 = inlined_call_operand.hbm [shape: f32[2,8,16], index: 2, kind: input, shape index: {}]   ;;  %s1603_s3 = inlined_call_operand.hbm [shape: f32[64,128], index: 3, kind: input, shape index: {}]   ;;  %s1604_s4 = inlined_call_operand.hbm [shape: f32[2,8,128], index: 4, kind: output, shape index: {}]  }
   0x1   :  { %1610 = sst [smem:[#allocation17_spill]] %s1603_s3  ;;  %s997_s17 = scalar_lea.hbm %s1600_s0, 16 }
   0x2   :  { %p998_p0 = scmp.ne.s32.totalorder %s1600_s0, %s997_s17  ;;  %p1001_p1 = scmp.lt.u32.totalorder %s997_s17, %s1600_s0 }
   0x4   :  { %p1003_p2 = pnand %p1001_p1, %p998_p0 }
   0x6   :  { %1006 = shalt.err (!%p1003_p2)  }
   0x7   :  { %s1189_s22 = smov [#allocation3]  }
   0x8   :  { %10 = dma.hbm_to_smem %s1600_s0, 16, %s1189_s22, [#allocation2] }
   0x9   :  { %1147 = dma.done.wait [#allocation2], 16 }
   0xa   :  { %1148 = vsyncadd [#allocation2], 4294967280 }
   0xb   :  { %12 = sfence }
   0xc   :  { %13 = vsyncpa [#allocation5], 0 }
   0xd   :  { %15 = vsyncpa [#allocation5 + $0x1], 0 }
   0xe   :  { %16 = vsyncpa [#allocation8], 0 }
   0xf   :  { %18 = vsyncpa [#allocation8 + $0x1], 0 }
  0x10   :  { %19 = vsyncpa [#allocation6], 0 }
  0x11   :  { %21 = vsyncpa [#allocation6 + $0x1], 0  ;;  %s1236_s25 = smov 0   ;;  %s1238_s26 = smov 0  }
  0x12   :  { %s1240_s27 = smov 0   ;;  %s1242_s28 = smov 0  }
  0x13   :  { %s1244_s29 = smov 0   ;;  %s1246_s0 = smov 0  }
  0x14 LB: > { %s1267_s30 = sadd.s32 4294967295, %s1187_s0   ;;  %s835_s5 = sadd.s32 4294967294, %s1187_s0   ;;  %s1187_s0 = sphi %s1246_s0, %s27_s0   ;;  %s1183_s29 = sphi %s1244_s29, %s1633_s29   ;;  %s1179_s28 = sphi %s1242_s28, %s1632_s28   ;;  %s1175_s27 = sphi %s1240_s27, %s1631_s27   ;;  %s1171_s26 = sphi %s1238_s26, %s1630_s26   ;;  %s1167_s25 = sphi %s1236_s25, %s1629_s25  }
  0x15   : > { %p61_p3 = scmp.ne.s32.totalorder %s1171_s26, %s1167_s25  ;;  %p1605_p4 = scmp.eq.s32.totalorder %s1267_s30, 0 }
  0x16   : > { %p142_p6 = scmp.eq.s32.totalorder %s835_s5, 1  ;;  %p836_p8 = scmp.ge.s32.totalorder %s1187_s0, 1 }
  0x17   : > { %p1276_p7 = por %p1605_p4, %p61_p3  ;;  %p149_p10 = scmp.lt.s32.totalorder %s1187_s0, 3 }
  0x18   : > { %p1281_p9 = por %p142_p6, %p61_p3  ;;  %s1190_s9 = smov [#allocation9]  }
  0x19   : > { %s1611_s6 = scalar_select %p1276_p7, 1, 0 }
  0x1a   : > { %s1612_s7 = scalar_select %p1281_p9, 1, 0 }
  0x1b   : > { %p1286_p11 = pnand %p836_p8, %p149_p10  ;;  %s161_s10 = sshll.u32 %s1190_s9, 4  ;;  %s162_s10 = int_to_ptr.vmem [resolvable:$true] %s161_s10 }
  0x1c   : > { %s39_s12 = sadd.s32 1, %s1183_s29  ;;  %s1615_s3 = sld [smem:[#allocation17_spill]] }
  0x1d   : > { %s1613_s8 = scalar_select %p1286_p11, 1, 0 }
  0x1e   : > { %p919_p12 = pneg %p1286_p11 }
  0x20   : > { %p1295_p0 = pnand %p919_p12, %p1605_p4 }
  0x22   : > { %s1007_s15 = scalar_lea.hbm %s1615_s3, 1024  ;;  %p1009_p2 = pneg %p1295_p0 }
  0x23   : > { %p1008_p1 = scmp.ne.s32.totalorder %s1615_s3, %s1007_s15  ;;  %p1014_p8 = scmp.lt.u32.totalorder %s1007_s15, %s1615_s3 }
  0x25   : > { %p1010_p3 = pnand %p1009_p2, %p1008_p1 }
  0x27   : > { %p1011_p6 = pneg %p1010_p3 }
  0x29   : > { %p1016_p10 = pnand %p1014_p8, %p1011_p6 }
  0x2b   : > { %1019 = shalt.err (!%p1016_p10)
}
  0x2c   : > { %s1020_s20 = scalar_lea.vmem %s162_s10, 1024  ;;  %p1028_p5 = scmp.lt.s32.totalorder %s162_s10, %s162_s10 }
  0x2d   : > { %p1021_p12 = scmp.ne.s32.totalorder %s162_s10, %s1020_s20  ;;  %p1029_p9 = scmp.lt.s32.totalorder %s1020_s20, %s1020_s20 }
  0x2f   : > { %p1023_p13 = pnand %p1021_p12, %p1009_p2  ;;  %p1030_p7 = por %p1029_p9, %p1028_p5 }
  0x31   : > { %p1024_p4 = pneg %p1023_p13 }
  0x33   : > { %p1031_p11 = pnand %p1030_p7, %p1024_p4 }
  0x35   : > { %1034 = shalt.err (!%p1031_p11)
}
  0x36   : > { %s1191_s21 = smov 128   ;;  %s1192_s22 = smov 8  }
  0x37   : > { %922 = dma.hbm_to_vmem [thread:$0]  (!%p1295_p0), %s1615_s3, 1024, %s162_s10, [#allocation8], %s1191_s21, %s1191_s21, %s1192_s22  }
  0x38   : > { %p41_p4 = scmp.ge.s32.totalorder %s39_s12, 2  ;;  %s48_s5 = sadd.s32 1, %s1175_s27 }
  0x39   : > { %p55_p5 = scmp.ne.s32.totalorder %s1175_s27, %s1171_s26  ;;  %p56_p7 = scmp.eq.s32.totalorder %s1187_s0, 0 }
  0x3a   : > { %s1635_s12 = smov (%p41_p4, %s39_s12), 0  ;;  %p1618_p11 = scmp.eq.s32.totalorder %s1267_s30, 1 }
  0x3b   : > { %1616 = sst [smem:[#allocation16_spill]] %s1635_s12  ;;  %p1322_p9 = por %p56_p7, %p55_p5 }
  0x3c   : > { %p1328_p13 = por %p1618_p11, %p55_p5  ;;  %s43_s13 = ssub.s32 %s1183_s29, %s1635_s12 }
  0x3d   : > { %p935_p0 = scmp.lt.s32.totalorder %s1187_s0, 2  ;;  %p46_p1 = scmp.eq.s32.totalorder %s43_s13, 0 }
  0x3e   : > { %s1619_s11 = scalar_select %p1328_p13, 1, 0 }
  0x3f   : > { %s175_s10 = sand.u32 1, %s1175_s27   ;;  %s840_s16 = sshll.u32 %s1183_s29, 7 }
  0x40   : > { %s1336_s14 = sshll.u32 %s175_s10, 3  ;;  %s1345_s19 = scalar_lea.hbm %s1601_s1, %s840_s16 }
  0x41   : > { %s1339_s15 = scalar_select %p46_p1, %s1175_s27, %s48_s5  }
  0x42   : > { %s179_s20 = scalar_lea.vmem [#allocation4], %s1336_s14  ;;  %p1352_p2 = pnand %p935_p0, %p1322_p9 }
  0x43   : > { %s187_s21 = sshll.u32 %s179_s20, 4  ;;  %s1359_s5 = scalar_lea.hbm %s1602_s2, %s840_s16  ;;  %s1348_s21 = int_to_ptr.vmem [resolvable:$true] %s187_s21 }
  0x44   : > { %s194_s13 = sand.u32 1, %s1187_s0   ;;  %s176_s17 = scalar_lea.sflag [#allocation5], %s175_s10 }
  0x45   : > { %s1035_s18 = scalar_lea.hbm %s1345_s19, 128  ;;  %p1037_p6 = pneg %p1352_p2 }
  0x46   : > { %p1036_p3 = scmp.ne.s32.totalorder %s1345_s19, %s1035_s18  ;;  %s1040_s3 = scalar_lea.hbm %s1601_s1, 256 }
  0x47   : > { %p1041_p12 = scmp.lt.u32.totalorder %s1345_s19, %s1601_s1  ;;  %p1042_p4 = scmp.lt.u32.totalorder %s1040_s3, %s1035_s18 }
  0x48   : > { %p1038_p8 = pnand %p1037_p6, %p1036_p3  ;;  %p1044_p7 = scmp.lt.u32.totalorder %s1035_s18, %s1345_s19 }
  0x49   : > { %p1043_p5 = por %p1042_p4, %p1041_p12 }
  0x4a   : > { %p1039_p10 = pneg %p1038_p8 }
  0x4b   : > { %p1045_p9 = por %p1044_p7, %p1043_p5 }
  0x4d   : > { %p1046_p11 = pnand %p1045_p9, %p1039_p10 }
  0x4f   : > { %1049 = shalt.err (!%p1046_p11)
}
  0x50   : > { %s1050_s10 = scalar_lea.vmem %s1348_s21, 128  ;;  %s1193_s16 = smov [#allocation4]  }
  0x51   : > { %p1051_p0 = scmp.ne.s32.totalorder %s1348_s21, %s1050_s10  ;;  %s1055_s24 = sshll.u32 %s1193_s16, 4  ;;  %s1056_s24 = int_to_ptr.vmem [resolvable:$false] %s1055_s24 }
  0x52   : > { %s1057_s12 = scalar_lea.vmem %s1056_s24, 256  ;;  %p1058_p8 = scmp.lt.s32.totalorder %s1348_s21, %s1056_s24 }
  0x53   : > { %p1053_p1 = pnand %p1051_p0, %p1037_p6  ;;  %p1059_p12 = scmp.lt.s32.totalorder %s1057_s12, %s1050_s10 }
  0x55   : > { %p1054_p3 = pneg %p1053_p1  ;;  %p1060_p4 = por %p1059_p12, %p1058_p8 }
  0x57   : > { %p1061_p5 = pnand %p1060_p4, %p1054_p3 }
  0x59   : > { %1064 = shalt.err (!%p1061_p5)
}
  0x5a   : > { %926 = dma.hbm_to_vmem [thread:$0]  (!%p1352_p2), %s1345_s19, 128, %s1348_s21, %s176_s17  }
  0x5b   : > { %s198_s3 = scalar_lea.vmem [#allocation7], %s1336_s14  ;;  %s195_s9 = scalar_lea.sflag [#allocation8], %s194_s13 }
  0x5c   : > { %s206_s18 = sshll.u32 %s198_s3, 4  ;;  %s1065_s20 = scalar_lea.hbm %s1359_s5, 128  ;;  %s207_s18 = int_to_ptr.vmem [resolvable:$true] %s206_s18 }
  0x5d   : > { %p1066_p10 = scmp.ne.s32.totalorder %s1359_s5, %s1065_s20  ;;  %s1070_s16 = scalar_lea.hbm %s1602_s2, 256 }
  0x5e   : > { %p1071_p11 = scmp.lt.u32.totalorder %s1359_s5, %s1602_s2  ;;  %p1072_p0 = scmp.lt.u32.totalorder %s1070_s16, %s1065_s20 }
  0x5f   : > { %p1068_p7 = pnand %p1066_p10, %p1037_p6  ;;  %p1074_p3 = scmp.lt.u32.totalorder %s1065_s20, %s1359_s5 }
  0x60   : > { %p1073_p1 = por %p1072_p0, %p1071_p11 }
  0x61   : > { %p1069_p9 = pneg %p1068_p7 }
  0x62   : > { %p1075_p8 = por %p1074_p3, %p1073_p1 }
  0x64   : > { %p1076_p12 = pnand %p1075_p8, %p1069_p9 }
  0x66   : > { %1079 = shalt.err (!%p1076_p12)
}
  0x67   : > { %s1080_s14 = scalar_lea.vmem %s207_s18, 128  ;;  %s1194_s19 = smov [#allocation7]  }
  0x68   : > { %p1081_p4 = scmp.ne.s32.totalorder %s207_s18, %s1080_s14  ;;  %s1085_s21 = sshll.u32 %s1194_s19, 4  ;;  %s1086_s21 = int_to_ptr.vmem [resolvable:$false] %s1085_s21 }
  0x69   : > { %s1087_s13 = scalar_lea.vmem %s1086_s21, 256  ;;  %p1088_p7 = scmp.lt.s32.totalorder %s207_s18, %s1086_s21 }
  0x6a   : > { %p1083_p5 = pnand %p1081_p4, %p1037_p6  ;;  %p1089_p13 = scmp.lt.s32.totalorder %s1087_s13, %s1080_s14 }
  0x6c   : > { %p1084_p10 = pneg %p1083_p5  ;;  %p1090_p0 = por %p1089_p13, %p1088_p7 }
  0x6e   : > { %p1091_p11 = pnand %p1090_p0, %p1084_p10 }
  0x70   : > { %1094 = shalt.err (!%p1091_p11)
}
  0x71   : > { %929 = dma.hbm_to_vmem [thread:$0]  (!%p1352_p2), %s1359_s5, 128, %s207_s18, %s195_s9  }
  0x72   : > { %p1621_p9 = scmp.ne.s32.totalorder %s1613_s8, 0 }
  0x73   : > { %s1412_s17 = sand.u32 (!%p1621_p9), 1, %s1171_s26   ;;  %p1622_p13 = scmp.ne.s32.totalorder (!%p1621_p9), %s1611_s6, 0 }
  0x74   : > { %215 = sbr.rel (%p1621_p9) target bundleno = 841 (0x349), region = 32  ;;  %s1415_s3 = sshll.u32 (!%p1621_p9), %s1412_s17, 3 }
  0x75   : > { %s218_s20 = scalar_lea.sflag (!%p1621_p9), [#allocation5], %s1412_s17  ;;  %s221_s23 = scalar_lea.vmem (!%p1621_p9), [#allocation4], %s1415_s3 }
  0x7b   : > { %1150 = dma.done.wait (%p1622_p13), %s218_s20, 128  }
  0x7c   : > { %1152 = vsyncadd (%p1622_p13), %s218_s20, 4294967168  ;;  %s226_s8 = sand.u32 1, %s1267_s30   ;;  %s230_s5 = scalar_lea.vmem [#allocation7], %s1415_s3 }
  0x7d   : > { %s227_s22 = scalar_lea.sflag [#allocation8], %s226_s8 }
  0x7e   : > { %1154 = dma.done.wait (%p1622_p13), %s227_s22, 128  }
  0x7f   : > { %1156 = vsyncadd (%p1622_p13), %s227_s22, 4294967168  ;;  %p1623_p2 = scmp.eq.s32.totalorder %s1267_s30, 0 }
  0x81   : > { %1158 = dma.done.wait (%p1623_p2), [#allocation8], 1024   ;;  %p1624_p6 = pmov %p1623_p2 }
  0x82   : > { %v272_v0 = vlaneseq  ;;  %vm264_vm0 = vcmask 130048   ;;  %v263_v4 = vld [vmem:[%s230_s5] sm:$0xff]  ;;  %v262_v5 = vld [vmem:[%s221_s23] sm:$0xff]  ;;  %v1195_v36 = vmov 0.0|0.0   ;;  %vm1196_vm2 = vmmov 0   ;;  %s689_s30 = sld [smem:[#allocation3 + %s1179_s28]] }
  0x83   : > { %1160 = vsyncadd (%p1624_p6), [#allocation8], 4294966272  ;;  %v265_v6 = vsel %vm264_vm0, %v263_v4, 0.0  ;;  %v587_v32 = vld [vmem:[#allocation9] sm:$0xff]  ;;  %v588_v33 = vld [vmem:[#allocation9 + $0x8] sm:$0xff]  ;;  %897 = vmatprep.subr.bf16.mxu0 %v1195_v36  ;;  %v1197_v48 = vmov 0.0  }
  0x84   : > { %v1433_v1 = vshrl.u32 %v272_v0, 7  ;;  %266 = vadd.xlane.f32.xlu0 %v265_v6  ;;  %v1443_v21 = vand.u32 127, %v272_v0  ;;  %v898_v34 = vpack.c.bf16 %v588_v33, %v587_v32  ;;  %v589_v37 = vld [vmem:[#allocation9 + $0x10] sm:$0xff]  ;;  %v590_v38 = vld [vmem:[#allocation9 + $0x18] sm:$0xff]  ;;  %v591_v41 = vld [vmem:[#allocation9 + $0x20] sm:$0xff]  ;;  %894 = vmatprep.mubr.msk.f32.mxu0 %vm1196_vm2, %v1197_v48  ;;  %vm514_vm5 = vcmask 523264  }
  0x85   : > { %v901_v39 = vpack.c.bf16 %v590_v38, %v589_v37  ;;  %v592_v42 = vld [vmem:[#allocation9 + $0x28] sm:$0xff]  ;;  %v593_v45 = vld [vmem:[#allocation9 + $0x30] sm:$0xff]  ;;  %v594_v46 = vld [vmem:[#allocation9 + $0x38] sm:$0xff]  ;;  %s866_s10 = sshll.u32 %s1179_s28, 7  ;;  %s261_s16 = scalar_lea.vmem [#allocation10], %s1415_s3 }
  0x86   : > { %v276_v2 = vsub.s32 0, %v1433_v1  ;;  %v287_v3 = vsub.s32 1, %v1433_v1  ;;  %v298_v9 = vsub.s32 2, %v1433_v1  ;;  %v309_v11 = vsub.s32 3, %v1433_v1  ;;  %899 = vmatpush3.bf16.msra.mxu0 %v898_v34  ;;  %s721_s24 = sshll.u32 %s261_s16, 4  ;;  %s1551_s19 = scalar_lea.hbm %s1604_s4, %s866_s10  ;;  %s1553_s24 = int_to_ptr.vmem [resolvable:$true] %s721_s24 }
  0x87   : > { %v320_v13 = vsub.s32 4, %v1433_v1  ;;  %v331_v15 = vsub.s32 5, %v1433_v1  ;;  %v342_v17 = vsub.s32 6, %v1433_v1  ;;  %v353_v19 = vsub.s32 7, %v1433_v1  ;;  %900 = vmatprep.subr.bf16.mxu0 %v1195_v36  ;;  %s707_s21 = scalar_lea.sflag [#allocation6], %s1412_s17  ;;  %s1095_s13 = scalar_lea.vmem %s1553_s24, 128 }
  0x88   : > { %v277_v7 = vrot.slane %v262_v5, %v276_v2  ;;  %v288_v8 = vrot.slane %v262_v5, %v287_v3  ;;  %v299_v10 = vrot.slane %v262_v5, %v298_v9  ;;  %v310_v12 = vrot.slane %v262_v5, %v309_v11  ;;  %p690_p1 = scmp.gt.s32.totalorder %s689_s30, 0  ;;  %p1096_p3 = scmp.ne.s32.totalorder %s1553_s24, %s1095_s13 }
  0x89   : > { %v321_v14 = vrot.slane %v262_v5, %v320_v13  ;;  %v332_v16 = vrot.slane %v262_v5, %v331_v15  ;;  %v343_v18 = vrot.slane %v262_v5, %v342_v17  ;;  %v354_v20 = vrot.slane %v262_v5, %v353_v19  ;;  %p1625_p8 = scmp.ne.s32.totalorder %s1619_s11, 0  ;;  %s1198_s28 = smov [#allocation10]  }
  0x8a   : > { %283 = vbcast.lane.b32.xlu1 %v277_v7, 264  ;;  %902 = vmatpush3.bf16.msra.mxu0 %v901_v39  ;;  %v904_v43 = vpack.c.bf16 %v592_v42, %v591_v41  ;;  %v907_v47 = vpack.c.bf16 %v594_v46, %v593_v45  ;;  %s691_s6 = scalar_select %p690_p1, 1, 0 }
  0x8b   : > { %903 = vmatprep.subr.bf16.mxu0 %v1195_v36  ;;  %p1097_p12 = pnand %p1096_p3, %p1625_p8  ;;  %s1099_s3 = sshll.u32 %s1198_s28, 4  ;;  %s1100_s3 = int_to_ptr.vmem [resolvable:$false] %s1099_s3 }
  0x8c   : > { %s692_s18 = scvt.s32.f32 %s691_s6  ;;  %s1101_s20 = scalar_lea.vmem %s1100_s3, 256 }
  0x8d   : > { %p1098_p4 = pneg %p1097_p12  ;;  %p1102_p5 = scmp.lt.s32.totalorder %s1553_s24, %s1100_s3 }
  0x8e   : > { %290 = vbcast.lane.b32.xlu1 %v288_v8, 256  ;;  %905 = vmatpush3.bf16.msra.mxu0 %v904_v43  ;;  %s701_s9 = ssub.f32 1.0, %s692_s18  ;;  %p1103_p10 = scmp.lt.s32.totalorder %s1101_s20, %s1095_s13 }
  0x8f   : > { %906 = vmatprep.subr.bf16.mxu0 %v1195_v36 }
  0x90   : > { %p1104_p7 = por %p1103_p10, %p1102_p5 }
  0x92   : > { %294 = vbcast.lane.b32.xlu1 %v288_v8, 264  ;;  %908 = vmatpush3.bf16.msra.mxu0 %v907_v47  ;;  %p1105_p0 = pnand %p1104_p7, %p1098_p4 }
  0x96   : > { %301 = vbcast.lane.b32.xlu1 %v299_v10, 256 }
  0x9a   : > { %305 = vbcast.lane.b32.xlu1 %v299_v10, 264  ;;  %279 = vbcast.lane.b32.xlu0 %v277_v7, 256 }
  0x9e   : > { %312 = vbcast.lane.b32.xlu1 %v310_v12, 256  ;;  %323 = vbcast.lane.b32.xlu0 %v321_v14, 256 }
  0xa2   : > { %316 = vbcast.lane.b32.xlu1 %v310_v12, 264  ;;  %334 = vbcast.lane.b32.xlu0 %v332_v16, 256 }
  0xa6   : > { %327 = vbcast.lane.b32.xlu1 %v321_v14, 264  ;;  %345 = vbcast.lane.b32.xlu0 %v343_v18, 256 }
  0xaa   : > { %338 = vbcast.lane.b32.xlu1 %v332_v16, 264  ;;  %356 = vbcast.lane.b32.xlu0 %v354_v20, 256 }
  0xae   : > { %349 = vbcast.lane.b32.xlu1 %v343_v18, 264 }
  0xb2   : > { %360 = vbcast.lane.b32.xlu1 %v354_v20, 264 }
  0xfc   : > { %v1445_v22 = vpop.permute.xlu1 %283 }
  0xfd   : > { %vm363_vm1 = vcmp.eq.s32.totalorder %v1445_v22, %v1443_v21 }
  0xfe   : > { %v849_v0 = vsel %vm363_vm1, 1.0, %v1197_v48  ;;  %vm603_vm1 = vcmask 1041409  }
 0x100   : > { %v291_v49 = vpop.permute.xlu1 %290 }
 0x101   : > { %vm364_vm4 = vcmp.eq.s32.totalorder %v291_v49, %v1443_v21 }
 0x102   : > { %v850_v8 = vsel %vm364_vm4, 1.0, %v1197_v48  ;;  %vm605_vm4 = vcmask 1042434  }
 0x104   : > { %v295_v50 = vpop.permute.xlu1 %294 }
 0x105   : > { %vm365_vm6 = vcmp.eq.s32.totalorder %v295_v50, %v1443_v21 }
 0x106   : > { %v851_v10 = vsel %vm365_vm6, 1.0, %v1197_v48  ;;  %vm607_vm6 = vcmask 1043459  }
 0x108   : > { %v302_v51 = vpop.permute.xlu1 %301 }
 0x109   : > { %vm366_vm7 = vcmp.eq.s32.totalorder %v302_v51, %v1443_v21 }
 0x10c   : > { %v306_v52 = vpop.permute.xlu1 %305 }
 0x10d   : > { %vm367_vm8 = vcmp.eq.s32.totalorder %v306_v52, %v1443_v21 }
 0x10e   : > { %v853_v18 = vsel %vm367_vm8, 1.0, %v1197_v48  ;;  %vm611_vm8 = vcmask 1045509  }
 0x110   : > { %v313_v53 = vpop.permute.xlu1 %312 }
 0x111   : > { %v267_v23 = vpop.xlane.xlu0 %266  ;;  %vm368_vm9 = vcmp.eq.s32.totalorder %v313_v53, %v1443_v21 }
 0x112   : > { %v268_v24 = vmax.f32 %v267_v23, 1e-06  ;;  %v854_v32 = vsel %vm368_vm9, 1.0, %v1197_v48  ;;  %vm613_vm9 = vcmask 1046534  }
 0x114   : > { %993 = vrcp.f32 %v268_v24  ;;  %v317_v54 = vpop.permute.xlu1 %316 }
 0x115   : > { %v280_v55 = vpop.permute.xlu0 %279  ;;  %vm369_vm10 = vcmp.eq.s32.totalorder %v317_v54, %v1443_v21 }
 0x116   : > { %vm362_vm3 = vcmp.eq.s32.totalorder %v280_v55, %v1443_v21 }
 0x118   : > { %v328_v56 = vpop.permute.xlu1 %327 }
 0x119   : > { %v1450_v57 = vpop.permute.xlu0 %323  ;;  %vm371_vm11 = vcmp.eq.s32.totalorder %v328_v56, %v1443_v21 }
 0x11a   : > { %vm370_vm13 = vcmp.eq.s32.totalorder %v1450_v57, %v1443_v21 }
 0x11b   : > { %v856_v52 = vsel %vm370_vm13, 1.0, %v1197_v48 }
 0x11c   : > { %v1452_v58 = vpop.permute.xlu1 %338 }
 0x11d   : > { %v1454_v59 = vpop.permute.xlu0 %334  ;;  %vm373_vm12 = vcmp.eq.s32.totalorder %v1452_v58, %v1443_v21 }
 0x11e   : > { %v994_v25 = vpop.eup %993  ;;  %vm372_vm14 = vcmp.eq.s32.totalorder %v1454_v59, %v1443_v21  ;;  %v859_v46 = vsel %vm373_vm12, 1.0, %v1197_v48 }
 0x11f   : > { %v271_v26 = vmul.f32 %v994_v25, %v263_v4  ;;  %v858_v56 = vsel %vm372_vm14, 1.0, %v1197_v48 }
 0x120   : > { %v1456_v60 = vpop.permute.xlu1 %349 }
 0x121   : > { %v413_v27 = vrot.slane %v271_v26, %v276_v2  ;;  %v424_v28 = vrot.slane %v271_v26, %v287_v3  ;;  %v435_v29 = vrot.slane %v271_v26, %v298_v9  ;;  %v446_v30 = vrot.slane %v271_v26, %v309_v11  ;;  %v1458_v61 = vpop.permute.xlu0 %345 }
 0x122   : > { %v457_v31 = vrot.slane %v271_v26, %v320_v13  ;;  %v468_v35 = vrot.slane %v271_v26, %v331_v15  ;;  %v479_v40 = vrot.slane %v271_v26, %v342_v17  ;;  %v490_v44 = vrot.slane %v271_v26, %v353_v19 }
 0x123   : > { %419 = vbcast.lane.b32.xlu1 %v413_v27, 264  ;;  %415 = vbcast.lane.b32.xlu0 %v413_v27, 256  ;;  %v848_v2 = vsel %vm362_vm3, 1.0, %v1197_v48  ;;  %v852_v19 = vsel %vm366_vm7, 1.0, %v1197_v48  ;;  %vm375_vm15 = vcmp.eq.s32.totalorder %v1456_v60, %v1443_v21  ;;  %vm374_vm0 = vcmp.eq.s32.totalorder %v1458_v61, %v1443_v21 }
 0x124   : > { %v1460_v62 = vpop.permute.xlu1 %360  ;;  %v861_v58 = vsel %vm375_vm15, 1.0, %v1197_v48  ;;  %vm609_vm7 = vcmask 1044484  }
 0x125   : > { %v1462_v63 = vpop.permute.xlu0 %356  ;;  %vm377_vm2 = vcmp.eq.s32.totalorder %v1460_v62, %v1443_v21 }
 0x126   : > { %vm376_vm3 = vcmp.eq.s32.totalorder %v1462_v63, %v1443_v21 }
 0x127   : > { %430 = vbcast.lane.b32.xlu1 %v424_v28, 264  ;;  %426 = vbcast.lane.b32.xlu0 %v424_v28, 256 }
 0x12b   : > { %441 = vbcast.lane.b32.xlu1 %v435_v29, 264  ;;  %437 = vbcast.lane.b32.xlu0 %v435_v29, 256 }
 0x12f   : > { %452 = vbcast.lane.b32.xlu1 %v446_v30, 264  ;;  %448 = vbcast.lane.b32.xlu0 %v446_v30, 256 }
 0x133   : > { %463 = vbcast.lane.b32.xlu1 %v457_v31, 264  ;;  %459 = vbcast.lane.b32.xlu0 %v457_v31, 256  ;;  %v855_v31 = vsel %vm369_vm10, 1.0, %v1197_v48  ;;  %vm615_vm10 = vcmask 1047559  }
 0x137   : > { %474 = vbcast.lane.b32.xlu1 %v468_v35, 264  ;;  %470 = vbcast.lane.b32.xlu0 %v468_v35, 256 }
 0x13b   : > { %485 = vbcast.lane.b32.xlu1 %v479_v40, 264  ;;  %481 = vbcast.lane.b32.xlu0 %v479_v40, 256  ;;  %v857_v40 = vsel %vm371_vm11, 1.0, %v1197_v48 }
 0x13f   : > { %496 = vbcast.lane.b32.xlu1 %v490_v44, 264  ;;  %492 = vbcast.lane.b32.xlu0 %v490_v44, 256 }
 0x195   : > { %v420_v1 = vpop.permute.xlu1 %419  ;;  %v416_v3 = vpop.permute.xlu0 %415 }
 0x196   : > { %v499_v4 = vmul.f32 %v849_v0, %v420_v1  ;;  %v498_v5 = vmul.f32 %v848_v2, %v416_v3 }
 0x198   : > { %v516_v6 = vsel %vm514_vm5, %v499_v4, 0.0  ;;  %v515_v7 = vsel %vm514_vm5, %v498_v5, 0.0 }
 0x199   : > { %v517_v9 = vadd.f32 %v516_v6, %v515_v7  ;;  %v431_v11 = vpop.permute.xlu1 %430  ;;  %v427_v12 = vpop.permute.xlu0 %426 }
 0x19a   : > { %v501_v13 = vmul.f32 %v851_v10, %v431_v11  ;;  %v500_v14 = vmul.f32 %v850_v8, %v427_v12  ;;  %v860_v11 = vsel %vm374_vm0, 1.0, %v1197_v48 }
 0x19b   : > { %v518_v15 = vrot.slane %v517_v9, 4 }
 0x19c   : > { %v525_v16 = vsel %vm514_vm5, %v501_v13, 0.0  ;;  %v524_v17 = vsel %vm514_vm5, %v500_v14, 0.0 }
 0x19d   : > { %v519_v20 = vadd.f32 %v518_v15, %v517_v9  ;;  %v526_v22 = vadd.f32 %v525_v16, %v524_v17  ;;  %v442_v23 = vpop.permute.xlu1 %441  ;;  %v438_v24 = vpop.permute.xlu0 %437 }
 0x19e   : > { %v503_v25 = vmul.f32 %v853_v18, %v442_v23  ;;  %v502_v26 = vmul.f32 %v852_v19, %v438_v24 }
 0x19f   : > { %v520_v27 = vrot.slane %v519_v20, 2  ;;  %v527_v28 = vrot.slane %v526_v22, 4 }
 0x1a0   : > { %v534_v29 = vsel %vm514_vm5, %v503_v25, 0.0  ;;  %v533_v30 = vsel %vm514_vm5, %v502_v26, 0.0  ;;  %v863_v26 = vsel %vm377_vm2, 1.0, %v1197_v48 }
 0x1a1   : > { %v521_v33 = vadd.f32 %v520_v27, %v519_v20  ;;  %v528_v34 = vadd.f32 %v527_v28, %v526_v22  ;;  %v535_v35 = vadd.f32 %v534_v29, %v533_v30  ;;  %v453_v36 = vpop.permute.xlu1 %452  ;;  %v449_v37 = vpop.permute.xlu0 %448 }
 0x1a2   : > { %v505_v38 = vmul.f32 %v855_v31, %v453_v36  ;;  %v504_v39 = vmul.f32 %v854_v32, %v449_v37 }
 0x1a3   : > { %v529_v41 = vrot.slane %v528_v34, 2  ;;  %v536_v42 = vrot.slane %v535_v35, 4  ;;  %v522_v43 = vrot.slane %v521_v33, 1 }
 0x1a4   : > { %v543_v44 = vsel %vm514_vm5, %v505_v38, 0.0  ;;  %v542_v45 = vsel %vm514_vm5, %v504_v39, 0.0 }
 0x1a5   : > { %v530_v47 = vadd.f32 %v529_v41, %v528_v34  ;;  %v537_v49 = vadd.f32 %v536_v42, %v535_v35  ;;  %v544_v50 = vadd.f32 %v543_v44, %v542_v45  ;;  %v464_v51 = vpop.permute.xlu1 %463  ;;  %v460_v53 = vpop.permute.xlu0 %459  ;;  %v523_v2 = vadd.f32 %v522_v43, %v521_v33 }
 0x1a6   : > { %v507_v54 = vmul.f32 %v857_v40, %v464_v51  ;;  %v506_v55 = vmul.f32 %v856_v52, %v460_v53  ;;  %v862_v33 = vsel %vm376_vm3, 1.0, %v1197_v48 }
 0x1a7   : > { %v531_v0 = vrot.slane %v530_v47, 1  ;;  %v538_v1 = vrot.slane %v537_v49, 2  ;;  %v545_v57 = vrot.slane %v544_v50, 4 }
 0x1a8   : > { %v552_v3 = vsel %vm514_vm5, %v507_v54, 0.0  ;;  %v551_v4 = vsel %vm514_vm5, %v506_v55, 0.0 }
 0x1a9   : > { %v532_v5 = vadd.f32 %v531_v0, %v530_v47  ;;  %v539_v59 = vadd.f32 %v538_v1, %v537_v49  ;;  %v546_v6 = vadd.f32 %v545_v57, %v544_v50  ;;  %v553_v7 = vadd.f32 %v552_v3, %v551_v4  ;;  %v475_v8 = vpop.permute.xlu1 %474  ;;  %v471_v9 = vpop.permute.xlu0 %470 }
 0x1aa   : > { %v509_v60 = vmul.f32 %v859_v46, %v475_v8  ;;  %v508_v10 = vmul.f32 %v858_v56, %v471_v9 }
 0x1ab   : > { %v604_v12 = vsel %vm603_vm1, %v532_v5, %v523_v2  ;;  %v540_v13 = vrot.slane %v539_v59, 1  ;;  %v547_v14 = vrot.slane %v546_v6, 2  ;;  %v554_v15 = vrot.slane %v553_v7, 4 }
 0x1ac   : > { %v561_v16 = vsel %vm514_vm5, %v509_v60, 0.0  ;;  %v560_v17 = vsel %vm514_vm5, %v508_v10, 0.0  ;;  %v699_v10 = vstv %s692_s18 }
 0x1ad   : > { %v541_v18 = vadd.f32 %v540_v13, %v539_v59  ;;  %v548_v19 = vadd.f32 %v547_v14, %v546_v6  ;;  %v555_v20 = vadd.f32 %v554_v15, %v553_v7  ;;  %v562_v22 = vadd.f32 %v561_v16, %v560_v17  ;;  %v486_v23 = vpop.permute.xlu1 %485  ;;  %v482_v24 = vpop.permute.xlu0 %481 }
 0x1ae   : > { %v511_v61 = vmul.f32 %v861_v58, %v486_v23  ;;  %v510_v25 = vmul.f32 %v860_v11, %v482_v24  ;;  %v702_v11 = vstv %s701_s9 }
 0x1af   : > { %v606_v27 = vsel %vm605_vm4, %v541_v18, %v604_v12  ;;  %v549_v28 = vrot.slane %v548_v19, 1  ;;  %v556_v29 = vrot.slane %v555_v20, 2  ;;  %v563_v30 = vrot.slane %v562_v22, 4 }
 0x1b0   : > { %v570_v31 = vsel %vm514_vm5, %v511_v61, 0.0  ;;  %v569_v32 = vsel %vm514_vm5, %v510_v25, 0.0 }
 0x1b1   : > { %v550_v34 = vadd.f32 %v549_v28, %v548_v19  ;;  %v557_v35 = vadd.f32 %v556_v29, %v555_v20  ;;  %v564_v36 = vadd.f32 %v563_v30, %v562_v22  ;;  %v571_v37 = vadd.f32 %v570_v31, %v569_v32  ;;  %v497_v62 = vpop.permute.xlu1 %496  ;;  %v493_v38 = vpop.permute.xlu0 %492 }
 0x1b2   : > { %v513_v39 = vmul.f32 %v863_v26, %v497_v62  ;;  %v512_v40 = vmul.f32 %v862_v33, %v493_v38 }
 0x1b3   : > { %v558_v41 = vrot.slane %v557_v35, 1  ;;  %v565_v42 = vrot.slane %v564_v36, 2  ;;  %v572_v43 = vrot.slane %v571_v37, 4  ;;  %v608_v44 = vsel %vm607_vm6, %v550_v34, %v606_v27 }
 0x1b4   : > { %v579_v45 = vsel %vm514_vm5, %v513_v39, 0.0  ;;  %v578_v46 = vsel %vm514_vm5, %v512_v40, 0.0 }
 0x1b5   : > { %v559_v21 = vadd.f32 %v558_v41, %v557_v35  ;;  %v566_v48 = vadd.f32 %v565_v42, %v564_v36  ;;  %v573_v63 = vadd.f32 %v572_v43, %v571_v37  ;;  %v580_v47 = vadd.f32 %v579_v45, %v578_v46 }
 0x1b7   : > { %v567_v49 = vrot.slane %v566_v48, 1  ;;  %v574_v50 = vrot.slane %v573_v63, 2  ;;  %v581_v51 = vrot.slane %v580_v47, 4  ;;  %v610_v52 = vsel %vm609_vm7, %v559_v21, %v608_v44 }
 0x1b9   : > { %v568_v53 = vadd.f32 %v567_v49, %v566_v48  ;;  %v575_v54 = vadd.f32 %v574_v50, %v573_v63  ;;  %v582_v55 = vadd.f32 %v581_v51, %v580_v47 }
 0x1bb   : > { %v576_v56 = vrot.slane %v575_v54, 1  ;;  %v583_v58 = vrot.slane %v582_v55, 2  ;;  %v612_v0 = vsel %vm611_vm8, %v568_v53, %v610_v52 }
 0x1bd   : > { %v577_v1 = vadd.f32 %v576_v56, %v575_v54  ;;  %v584_v57 = vadd.f32 %v583_v58, %v582_v55 }
 0x1bf   : > { %v585_v2 = vrot.slane %v584_v57, 1  ;;  %v614_v3 = vsel %vm613_vm9, %v577_v1, %v612_v0 }
 0x1c1   : > { %v586_v4 = vadd.f32 %v585_v2, %v584_v57 }
 0x1c3   : > { %v616_v5 = vsel %vm615_vm10, %v586_v4, %v614_v3 }
 0x1c4   : > { %895 = vmatmul.mubr.msk.f32.vlgmr.msra.gmra.mrb[0].mxu0 %vm514_vm5, %v616_v5 }
 0x297   : > { %v685_v59 = vpop.f32.mrb[0].mxu0 }
 0x298   : > { %v896_v6 = vpop.f32.mrb[1].mxu0  ;;  %v693_v7 = vmul.f32 %v685_v59, %v685_v59  ;;  %v703_v13 = vmul.f32 %v702_v11, %v685_v59 }
 0x29a   : > { %694 = vadd.xlane.f32.xlu0 %v693_v7 }
 0x327   : > { %v695_v8 = vpop.xlane.xlu0 %694 }
 0x328   : > { %v696_v9 = vmax.f32 %v695_v8, 1e-12 }
 0x32a   : > { %995 = vrsqrt.f32 %v696_v9 }
 0x334   : > { %v996_v60 = vpop.eup %995 }
 0x335   : > { %v698_v12 = vmul.f32 %v996_v60, %v685_v59 }
 0x337   : > { %v700_v14 = vmul.f32 %v699_v10, %v698_v12 }
 0x339   : > { %v704_v15 = vadd.f32 %v703_v13, %v700_v14 }
 0x33b   : > { %705 = vst [vmem:[%s261_s16] sm:$0xff] %v704_v15 }
 0x33c   : > { %1108 = shalt.err (!%p1105_p0)
}
 0x33d   : > { %s1109_s17 = scalar_lea.hbm %s1551_s19, 128  ;;  %s1113_s22 = scalar_lea.hbm %s1604_s4, 256 }
 0x33e   : > { %p1110_p11 = scmp.ne.s32.totalorder %s1551_s19, %s1109_s17  ;;  %p1114_p2 = scmp.lt.u32.totalorder %s1551_s19, %s1604_s4 }
 0x33f   : > { %p1115_p6 = scmp.lt.u32.totalorder %s1113_s22, %s1109_s17  ;;  %p1117_p3 = scmp.lt.u32.totalorder %s1109_s17, %s1551_s19 }
 0x340   : > { %p1111_p9 = pnand %p1110_p11, %p1625_p8 }
 0x341   : > { %p1116_p1 = por %p1115_p6, %p1114_p2 }
 0x342   : > { %p1112_p13 = pneg %p1111_p9 }
 0x343   : > { %p1118_p12 = por %p1117_p3, %p1116_p1 }
 0x345   : > { %p1119_p4 = pnand %p1118_p12, %p1112_p13 }
 0x347   : > { %1122 = shalt.err (!%p1119_p4)
}
 0x348   : > { %917 = dma.vmem_to_hbm [thread:$0]  (%p1625_p8), %s1553_s24, 128, %s1551_s19, %s707_s21  }
 0x349 PF: > { %s733_s6 = sand.u32 1, %s1167_s25   ;;  %p1626_p5 = scmp.ne.s32.totalorder %s1612_s7, 0 }
 0x34a   : > { %p1627_p10 = scmp.ge.s32.totalorder %s1187_s0, 2  ;;  %s734_s18 = scalar_lea.sflag [#allocation6], %s733_s6 }
 0x34c   : > { %p931_p7 = pnand %p1627_p10, %p1626_p5 }
 0x34e   : > { %1162 = dma.done.wait (!%p931_p7), %s734_s18, 128  }
 0x34f   : > { %1164 = vsyncadd (!%p931_p7), %s734_s18, 4294967168  ;;  %s27_s0 = sadd.s32 1, %s1187_s0   ;;  %s1628_s11 = sld [smem:[#allocation16_spill]] }
 0x350   : > { %p24_p0 = scmp.ge.s32.totalorder %s27_s0, 4   ;;  %s1629_s25 = smov %s1171_s26 }
 0x351   : > { %s1630_s26 = smov %s1175_s27  ;;  %s1631_s27 = smov %s1339_s15 }
 0x352   : > { %s1632_s28 = smov %s1183_s29  ;;  %26 = sbr.rel (!%p24_p0) target bundleno = 20 (0x14), region = 94 }
 0x355   : > { %s1633_s29 = smov %s1628_s11 }
 0x359   :  { %739 = vsyncpa [#allocation5], 1 }
 0x35a   :  { %741 = vsyncpa [#allocation5 + $0x1], 1 }
 0x35b   :  { %742 = vsyncpa [#allocation8], 1 }
 0x35c   :  { %744 = vsyncpa [#allocation8 + $0x1], 1 }
 0x35d   :  { %745 = vsyncpa [#allocation6], 1 }
 0x35e   :  { %747 = vsyncpa [#allocation6 + $0x1], 1 }

</bundles_post_ra>
